<compile_context>
chip_gen: v7x
topology: tpu7x:2x2x1
jax: 0.10.0
libtpu: 0.0.40
codegen_flags: <defaults>
</compile_context>

<pallas_src>
import jax
import jax.numpy as jnp
from jax.experimental import pallas as pl
from jax.experimental.pallas import tpu as pltpu

VOCAB = 8
DIM = 64
PACK = 2                       # tokens packed per 128-lane output row
LANES = PACK * DIM             # 128 -> lane-dense output stores
PACKED_VOCAB = PACK * VOCAB    # 16
TARGET_SPLITS = 4              # >= 2 TCs (v7x) x double-buffering


def _round_up(x, m):
    return ((x + m - 1) // m) * m


def _embed_kernel(idx_ref, w_ref, o_ref):
    """One grid step: gather 2*TN2 embeddings, two per 128-lane row.

    idx_ref: (TN2, 2) int32  -- raw token-id pairs (no pre-offset)
    w_ref:   (16, 128) f32   -- block-diagonal [[W, 0], [0, W]]
    o_ref:   (TN2, 128)      -- [emb(tok0) | emb(tok1)] per row
    """
    idx = idx_ref[...]                                               # (TN2, 2)
    rows = idx.shape[0]
    vocab_ids = jax.lax.broadcasted_iota(jnp.int32, (rows, PACKED_VOCAB), 1)
    # Two ones per row: column-0 token matches ids in [0, 8); the column-1
    # token's +VOCAB offset is folded into the constant iota (vocab_ids - 8).
    onehot = ((idx[:, 0:1] == vocab_ids) |
              (idx[:, 1:2] == vocab_ids - VOCAB)).astype(w_ref.dtype)
    acc = jnp.dot(onehot, w_ref[...],
                  preferred_element_type=jnp.float32,
                  precision=jax.lax.Precision.HIGHEST)               # exact f32
    o_ref[...] = acc.astype(o_ref.dtype)                             # (TN2, 128)


def embed_forward(x_idx, weight, *, tile_rows=2048, out_dtype=jnp.float32):
    """x_idx: int array of any shape. weight: (VOCAB, DIM). Returns x.shape + (DIM,)."""
    out_shape = x_idx.shape + (DIM,)
    n = int(x_idx.size)
    if n == 0:                                   # empty-input guard
        return jnp.zeros(out_shape, dtype=out_dtype)

    n_pairs = -(-n // PACK)

    # Tile rows: large enough for roofline streaming (1 MiB f32 out tile at
    # 2048), capped so large inputs get >= TARGET_SPLITS grid steps (v7x
    # megacore), always a multiple of 8 sublanes.
    tn2 = min(_round_up(tile_rows, 8),
              max(8, _round_up(-(-n_pairs // TARGET_SPLITS), 8)))
    grid = (-(-n_pairs // tn2),)                 # last block may be partial

    idx_flat = x_idx.reshape(-1).astype(jnp.int32)
    if n_pairs * PACK != n:                      # odd token count: pad 1 id
        idx_flat = jnp.pad(idx_flat, (0, n_pairs * PACK - n))
    idx_pairs = idx_flat.reshape(n_pairs, PACK)

    # Block-diagonal packed table: (16, 128) = [[W, 0], [0, W]]
    w = weight.astype(jnp.float32)
    zeros = jnp.zeros((VOCAB, DIM), dtype=jnp.float32)
    w_packed = jnp.concatenate(
        [jnp.concatenate([w, zeros], axis=1),
         jnp.concatenate([zeros, w], axis=1)], axis=0)

    out_bytes = jnp.dtype(out_dtype).itemsize
    # Explicit per-step VMEM budget (double-buffered): index tile lane-pads
    # 2 -> 128 lanes in VMEM, output tile is (tn2, 128); table is tiny.
    working = (2 * (tn2 * 128 * 4 + tn2 * LANES * out_bytes)
               + 2 * PACKED_VOCAB * LANES * 4)
    vmem_limit = int(min(max(working + (2 << 20), 16 << 20), 32 << 20))

    out_packed = pl.pallas_call(
        _embed_kernel,
        out_shape=jax.ShapeDtypeStruct((n_pairs, LANES), out_dtype),
        grid_spec=pl.GridSpec(
            grid=grid,
            in_specs=[
                pl.BlockSpec((tn2, PACK), lambda i: (i, 0)),
                pl.BlockSpec((PACKED_VOCAB, LANES), lambda i: (0, 0)),
            ],
            out_specs=pl.BlockSpec((tn2, LANES), lambda i: (i, 0)),
        ),
        compiler_params=pltpu.CompilerParams(
            dimension_semantics=("parallel",),   # independent tiles -> megacore
            vmem_limit_bytes=vmem_limit,
        ),
        cost_estimate=pl.CostEstimate(
            flops=2 * n_pairs * PACKED_VOCAB * LANES,
            transcendentals=0,
            bytes_accessed=(n_pairs * PACK * 4           # indices
                            + PACKED_VOCAB * LANES * 4   # packed table
                            + n_pairs * LANES * out_bytes),
        ),
    )(idx_pairs, w_packed)

    # (n_pairs, 128) -> (2*n_pairs, 64): contiguous reshape (free).  Only an
    # odd token count requires the (single-token) un-pad slice.
    out = out_packed.reshape(n_pairs * PACK, DIM)
    if n_pairs * PACK != n:
        out = out[:n]
    return out.reshape(out_shape)


if __name__ == "__main__":
    key = jax.random.PRNGKey(0)
    k_w, k_x = jax.random.split(key)

    # Deterministic parameter init (nn.Embedding default: N(0, 1)).
    weight = jax.random.normal(k_w, (VOCAB, DIM), dtype=jnp.float32)

    # Small input consistent with the module: batch=2, seq=8 token ids in [0, 8).
    x = jax.random.randint(k_x, (2, 8), 0, VOCAB, dtype=jnp.int32)

    out = embed_forward(x, weight)
    out = jax.block_until_ready(out)

    # Reference check: plain gather.
    ref = jnp.take(weight, x, axis=0)
    assert out.shape == (2, 8, DIM)
    assert out.dtype == jnp.float32
    assert jnp.allclose(out, ref, atol=1e-6), "mismatch vs reference gather"

    print("KERNEL_OK")
</pallas_src>

<mosaic_0001>
module attributes {stable_mosaic.version = 11 : i64} {
  func.func @_embed_kernel(%arg0: i32, %arg1: memref<8x2xi32, #tpu.memory_space<vmem>>, %arg2: memref<16x128xf32, #tpu.memory_space<vmem>>, %arg3: memref<8x128xf32, #tpu.memory_space<vmem>>) attributes {dimension_semantics = [#tpu.dimension_semantics<parallel>], iteration_bounds = array<i64: 1>, scalar_prefetch = 0 : i64, scratch_operands = 0 : i64, tpu.core_type = #tpu.core_type<tc>, window_params = [{transform_indices = @transform_0, window_bounds = array<i64: 8, 2>}, {pipeline_mode = #tpu.pipeline_mode<synchronous>, transform_indices = @transform_1, window_bounds = array<i64: 16, 128>}, {transform_indices = @transform_2, window_bounds = array<i64: 8, 128>}]} {
    %c0 = arith.constant 0 : index
    %c0_0 = arith.constant 0 : index
    %0 = vector.load %arg1[%c0, %c0_0] : memref<8x2xi32, #tpu.memory_space<vmem>>, vector<8x2xi32>
    %1 = tpu.iota {dimensions = array<i32: 1>} : vector<8x16xi32>
    %2 = vector.extract_strided_slice %0 {offsets = [0, 0], sizes = [8, 1], strides = [1, 1]} : vector<8x2xi32> to vector<8x1xi32>
    %3 = vector.broadcast %2 : vector<8x1xi32> to vector<8x16xi32>
    %4 = arith.cmpi eq, %3, %1 : vector<8x16xi32>
    %5 = vector.extract_strided_slice %0 {offsets = [0, 1], sizes = [8, 1], strides = [1, 1]} : vector<8x2xi32> to vector<8x1xi32>
    %c8_i32 = arith.constant 8 : i32
    %6 = vector.broadcast %c8_i32 : i32 to vector<8x16xi32>
    %7 = arith.subi %1, %6 : vector<8x16xi32>
    %8 = vector.broadcast %5 : vector<8x1xi32> to vector<8x16xi32>
    %9 = arith.cmpi eq, %8, %7 : vector<8x16xi32>
    %10 = arith.ori %4, %9 : vector<8x16xi1>
    %11 = arith.extui %10 : vector<8x16xi1> to vector<8x16xi32>
    %12 = arith.sitofp %11 : vector<8x16xi32> to vector<8x16xf32>
    %c0_1 = arith.constant 0 : index
    %c0_2 = arith.constant 0 : index
    %13 = vector.load %arg2[%c0_1, %c0_2] : memref<16x128xf32, #tpu.memory_space<vmem>>, vector<16x128xf32>
    %cst = arith.constant dense<0.000000e+00> : vector<8x128xf32>
    %14 = tpu.matmul %12, %13, %cst {dimension_numbers = #tpu.dot_dimension_numbers<[1], [0], [0], [1], [0, 0, 1, 1], [], []>, precision = #tpu.contract_precision<fp32>} : vector<8x16xf32>, vector<16x128xf32>, vector<8x128xf32> -> vector<8x128xf32>
    %c0_3 = arith.constant 0 : index
    %c0_4 = arith.constant 0 : index
    %15 = vector.load %arg3[%c0_3, %c0_4] : memref<8x128xf32, #tpu.memory_space<vmem>>, vector<8x128xf32>
    tpu.vector_store %arg3[%c0_3, %c0_4], %14 {strides = array<i32>} : memref<8x128xf32, #tpu.memory_space<vmem>>, vector<8x128xf32>,
    return
  }
  func.func @transform_0(%arg0: i32) -> (i32, i32) {
    %c0_i32 = arith.constant 0 : i32
    %c0_i32_0 = arith.constant 0 : i32
    return %arg0, %c0_i32 : i32, i32
  }
  func.func @transform_1(%arg0: i32) -> (i32, i32) {
    %c0_i32 = arith.constant 0 : i32
    %c0_i32_0 = arith.constant 0 : i32
    %c0_i32_1 = arith.constant 0 : i32
    return %c0_i32, %c0_i32_0 : i32, i32
  }
  func.func @transform_2(%arg0: i32) -> (i32, i32) {
    %c0_i32 = arith.constant 0 : i32
    %c0_i32_0 = arith.constant 0 : i32
    return %arg0, %c0_i32 : i32, i32
  }
}

</mosaic_0001>

<bundles_post_ra>
// kernel: tpu_custom_call.1
= control target key start
LH: loop header
LB: loop body
LE: loop exit
PB: predicated region body
PF: predicated region fallthrough
CT: control target
= control target key end

     0   :  { %7 = vsyncpa [#allocation3], 0  ;;  %s734_s0 = inlined_call_operand.vmem [shape: s32[8,2], index: 0, kind: input, shape index: {}]   ;;  %s735_s1 = inlined_call_operand.hbm [shape: f32[16,128], index: 1, kind: input, shape index: {}]   ;;  %s736_s2 = inlined_call_operand.hbm [shape: f32[8,128], index: 2, kind: output, shape index: {}]  }
   0x1   :  { %8 = vsyncpa [#allocation4], 0  ;;  %s673_s9 = smov [#allocation2]   ;;  %s625_s13 = scalar_lea.hbm %s735_s1, 256 }
   0x2   :  { %s16_s10 = sshll.u32 %s673_s9, 4  ;;  %p626_p0 = scmp.ne.s32.totalorder %s735_s1, %s625_s13  ;;  %s17_s10 = int_to_ptr.vmem [resolvable:$true] %s16_s10 }
   0x3   :  { %p629_p1 = scmp.lt.u32.totalorder %s625_s13, %s735_s1 }
   0x5   :  { %p631_p2 = pnand %p629_p1, %p626_p0 }
   0x7   :  { %634 = shalt.err (!%p631_p2)
}
   0x8   :  { %s635_s18 = scalar_lea.vmem %s17_s10, 256  ;;  %p640_p4 = scmp.lt.s32.totalorder %s17_s10, %s17_s10 }
   0x9   :  { %p636_p3 = scmp.ne.s32.totalorder %s17_s10, %s635_s18  ;;  %p641_p5 = scmp.lt.s32.totalorder %s635_s18, %s635_s18 }
   0xb   :  { %p642_p6 = por %p641_p5, %p640_p4 }
   0xd   :  { %p643_p7 = pnand %p642_p6, %p636_p3 }
   0xf   :  { %646 = shalt.err (!%p643_p7)
}
  0x10   :  { %s674_s19 = smov 128   ;;  %s675_s20 = smov 8  }
  0x11   :  { %22 = dma.hbm_to_vmem [thread:$0]  %s735_s1, 256, %s17_s10, [#allocation3], %s674_s19, %s674_s19, %s675_s20  }
  0x12   :  { %669 = dma.done.wait [#allocation3], 256  }
  0x13   :  { %670 = vsyncadd [#allocation3], 4294967040  ;;  %v676_v0 = vmov 0   ;;  %v26_v1 = vld [vmem:[%s734_s0] sm:$0xff]  ;;  %v677_v2 = vmov 1   ;;  %v42_v4 = vld [vmem:[#allocation2 + $0x8] sm:$0xff]  ;;  %v27_v21 = vlaneseq }
  0x14   :  { %623 = vset.pattern.permute.xlu0 %v676_v0  ;;  %v41_v3 = vld [vmem:[#allocation2] sm:$0xff]  ;;  %v51_v6 = vand.u32 4294901760, %v42_v4  ;;  %v678_v8 = vmov 0.0|0.0   ;;  %vm679_vm0 = vmmov 0   ;;  %v680_v11 = vmov 0.0   ;;  %s681_s0 = smov [#allocation5]  }
  0x15   :  { %30 = vperm.xlu0 %623, %v26_v1   ;;  %v48_v5 = vand.u32 4294901760, %v41_v3  ;;  %596 = vmatprep.subr.bf16.mxu0 %v678_v8  ;;  %v28_v22 = vand.u32 127, %v27_v21  ;;  %vm43_vm2 = vcmask 130048   ;;  %s513_s1 = sshll.u32 %s681_s0, 4  ;;  %s514_s1 = int_to_ptr.vmem [resolvable:$true] %s513_s1 }
  0x16   :  { %v133_v10 = vsub.f32 %v42_v4, %v51_v6  ;;  %587 = vmatprep.subr.bf16.mxu1 %v678_v8  ;;  %570 = vmatprep.mubr.msk.f32.mxu0 %vm679_vm0, %v680_v11  ;;  %s647_s25 = scalar_lea.vmem %s514_s1, 128  ;;  %p652_p9 = scmp.lt.s32.totalorder %s514_s1, %s514_s1 }
  0x17   :  { %v588_v7 = vpack.c.bf16 %v51_v6, %v48_v5  ;;  %v126_v9 = vsub.f32 %v41_v3, %v48_v5  ;;  %549 = vmatprep.mubr.msk.f32.mxu1 %vm679_vm0, %v680_v11  ;;  %v522_v24 = vadd.s32 4294967288, %v28_v22  ;;  %p648_p8 = scmp.ne.s32.totalorder %s514_s1, %s647_s25  ;;  %p653_p10 = scmp.lt.s32.totalorder %s647_s25, %s647_s25 }
  0x18   :  { %v134_v13 = vand.u32 4294901760, %v133_v10 }
  0x19   :  { %624 = vset.pattern.permute.xlu0 %v677_v2  ;;  %598 = vmatpush3.bf16.msra.mxu0 %v588_v7  ;;  %v127_v12 = vand.u32 4294901760, %v126_v9  ;;  %v594_v20 = vpack.c.bf16 %v133_v10, %v126_v9  ;;  %p654_p11 = por %p653_p10, %p652_p9 }
  0x1a   :  { %35 = vperm.xlu0 %624, %v26_v1   ;;  %589 = vmatpush3.bf16.msra.mxu1 %v588_v7  ;;  %v135_v15 = vsub.f32 %v133_v10, %v134_v13 }
  0x1b   :  { %590 = vmatprep.subr.bf16.mxu1 %v678_v8  ;;  %599 = vmatprep.subr.bf16.mxu0 %v678_v8  ;;  %v128_v14 = vsub.f32 %v126_v9, %v127_v12  ;;  %v600_v16 = vpack.c.bf16 %v134_v13, %v127_v12  ;;  %p655_p12 = pnand %p654_p11, %p648_p8 }
  0x1c   :  { %v136_v18 = vand.u32 4294901760, %v135_v15 }
  0x1d   :  { %v129_v17 = vand.u32 4294901760, %v128_v14 }
  0x1f   :  { %v591_v19 = vpack.c.bf16 %v136_v18, %v129_v17 }
  0x94   :  { %v31_v23 = vpop.permute.xlu0 %30 }
  0x95   :  { %vm32_vm1 = vcmp.eq.s32.totalorder %v31_v23, %v28_v22 }
  0x99   :  { %v36_v25 = vpop.permute.xlu0 %35 }
  0x9a   :  { %vm37_vm3 = vcmp.eq.s32.totalorder %v36_v25, %v522_v24 }
  0x9b   :  { %vm38_vm4 = vmor %vm32_vm1, %vm37_vm3 }
  0x9c   :  { %v523_v26 = vsel %vm38_vm4, 1.0, %v680_v11 }
  0x9d   :  { %v45_v27 = vsel %vm43_vm2, %v523_v26, 0 }
  0x9e   :  { %v115_v28 = vsub.f32 %v45_v27, %v45_v27 }
  0xa0   :  { %v116_v29 = vand.u32 4294901760, %v115_v28 }
  0xa2   :  { %571 = vmatmul.mubr.f32.vlgmr.msra.gmra.mrb[0].mxu0 %v116_v29  ;;  %v117_v30 = vsub.f32 %v115_v28, %v116_v29 }
  0xa3   :  { %601 = vmatpush3.bf16.msra.mxu0 %v600_v16  ;;  %577 = vmatprep.mubr.msk.f32.mxu0 %vm679_vm0, %v680_v11 }
  0xa4   :  { %v118_v31 = vand.u32 4294901760, %v117_v30  ;;  %602 = vmatprep.subr.bf16.mxu0 %v678_v8 }
  0xa6   :  { %550 = vmatmul.mubr.f32.vlgmr.msra.gmra.mrb[0].mxu1 %v118_v31 }
  0xa7   :  { %592 = vmatpush3.bf16.msra.mxu1 %v591_v19  ;;  %556 = vmatprep.mubr.msk.f32.mxu1 %vm679_vm0, %v680_v11 }
  0xa8   :  { %593 = vmatprep.subr.bf16.mxu1 %v678_v8 }
  0xaa   :  { %578 = vmatmul.mubr.msk.f32.vlgmr.msra.gmra.mrb[0].mxu0 %vm43_vm2, %v523_v26 }
  0xab   :  { %604 = vmatpush3.bf16.msra.mxu0 %v588_v7  ;;  %584 = vmatprep.mubr.msk.f32.mxu0 %vm679_vm0, %v680_v11 }
  0xae   :  { %557 = vmatmul.mubr.msk.f32.vlgmr.msra.gmra.mrb[0].mxu1 %vm43_vm2, %v523_v26 }
  0xaf   :  { %595 = vmatpush3.bf16.msra.mxu1 %v594_v20  ;;  %563 = vmatprep.mubr.msk.f32.mxu1 %vm679_vm0, %v680_v11 }
  0xb2   :  { %585 = vmatmul.mubr.msk.f32.vlgmr.msra.gmra.mrb[0].mxu0 %vm43_vm2, %v523_v26 }
  0xb6   :  { %564 = vmatmul.mubr.f32.vlgmr.msra.gmra.mrb[0].mxu1 %v115_v28 }
 0x185   :  { %v502_v32 = vpop.f32.mrb[0].mxu0 }
 0x186   :  { %v586_v33 = vpop.f32.mrb[1].mxu0 }
 0x189   :  { %v277_v34 = vpop.f32.mrb[0].mxu1 }
 0x18a   :  { %v605_v35 = vadd.f32 %v502_v32, %v277_v34  ;;  %v565_v36 = vpop.f32.mrb[1].mxu1 }
 0x18c   :  { %506 = vst [vmem:[#allocation5] sm:$0xff] %v605_v35 }
 0x18d   :  { %658 = shalt.err (!%p655_p12)
}
 0x18e   :  { %s659_s28 = scalar_lea.hbm %s736_s2, 128 }
 0x18f   :  { %p660_p13 = scmp.ne.s32.totalorder %s736_s2, %s659_s28  ;;  %p663_p0 = scmp.lt.u32.totalorder %s659_s28, %s736_s2 }
 0x191   :  { %p665_p1 = pnand %p663_p0, %p660_p13 }
 0x193   :  { %668 = shalt.err (!%p665_p1)
}
 0x194   :  { %516 = dma.vmem_to_hbm [thread:$0]  %s514_s1, 128, %s736_s2, [#allocation4]  }
 0x195   :  { %671 = dma.done.wait [#allocation4], 128  }
 0x196   :  { %672 = vsyncadd [#allocation4], 4294967168 }
 0x197   :  { %520 = vsyncpa [#allocation3], 1 }
 0x198   :  { %521 = vsyncpa [#allocation4], 1 }

</bundles_post_ra>
